<compile_context>
chip_gen: v5e
topology: v5e:2x2
jax: 0.10.0
libtpu: 0.0.40
codegen_flags: <defaults>
</compile_context>

<pallas_src>
import jax
import jax.numpy as jnp
from jax.experimental import pallas as pl
from jax.experimental.pallas import tpu as pltpu

DICE_DELTA = 1e-5


# --------------------------------------------------------------------------- #
# Pallas kernel: per-element BCE-with-logits + per-sample dice partial sums.  #
# --------------------------------------------------------------------------- #
def _seg_loss_kernel(x_ref, t_ref, bce_ref, dice_ref, a_acc, b_acc, c_acc):
    j = pl.program_id(1)  # N-tile (reduction) index; last grid axis

    @pl.when(j == 0)
    def _():
        a_acc[...] = jnp.zeros_like(a_acc)
        b_acc[...] = jnp.zeros_like(b_acc)
        c_acc[...] = jnp.zeros_like(c_acc)

    x = x_ref[...].astype(jnp.float32)
    t = t_ref[...].astype(jnp.float32)

    # One transcendental exp per element, reused for BCE and sigmoid.
    e = jnp.exp(-jnp.abs(x))
    # Numerically stable BCE-with-logits (reduction='none'):
    #   max(x, 0) - x*t + log(1 + exp(-|x|))
    bce = jnp.maximum(x, 0.0) - x * t + jnp.log(1.0 + e)
    bce_ref[...] = bce.astype(bce_ref.dtype)

    # Exact sigmoid from the same e (HBM-bound => the divide is essentially free).
    p = jnp.where(x >= 0.0, 1.0, e) / (1.0 + e)

    a_acc[...] += jnp.sum(p * t, axis=1, keepdims=True)
    b_acc[...] += jnp.sum(p * p, axis=1, keepdims=True)
    c_acc[...] += jnp.sum(t * t, axis=1, keepdims=True)

    @pl.when(j == pl.num_programs(1) - 1)
    def _():
        dice_ref[...] = 1.0 - (2.0 * a_acc[...]) / (
            b_acc[...] + c_acc[...] + DICE_DELTA)


# --------------------------------------------------------------------------- #
# Tiling helpers                                                              #
# --------------------------------------------------------------------------- #
def _pick_tiles(B, N, x_dtype, t_dtype, o_dtype, max_tile_n, vmem_budget_bytes):
    """Pick (tb, tn) batch/lane tiles.

    tb: sublane-aligned and giving >= 2 'parallel' grid blocks (v7x megacore)
        when B allows it; otherwise the whole batch as one block (single-TC
        v5e/v6e prefer fewer, larger blocks anyway).
    tn: largest 128-multiple such that the double-buffered (2 in + 1 out)
        pipeline blocks stay under vmem_budget_bytes, capped at max_tile_n.
    """
    isz = lambda d: jnp.dtype(d).itemsize
    # Packed-sublane granularity: 8 rows for 4-byte dtypes, 16 for 2-byte.
    sub = 8 if min(isz(x_dtype), isz(t_dtype), isz(o_dtype)) >= 4 else 16

    if B % sub == 0 and B >= 2 * sub:
        tb = (B // 2) // sub * sub
        while tb > sub and B % tb:
            tb -= sub
    else:
        # TODO(synk): for tiny B on v7x, a 2-way split of the N axis into
        # parallel super-chunks (partial a/b/c combined in JAX) would keep the
        # second TensorCore busy; not worth the complexity here.
        tb = B

    bytes_per_elem = 2 * (isz(x_dtype) + isz(t_dtype) + isz(o_dtype))  # dbl-buffered
    n_pad128 = pl.cdiv(N, 128) * 128
    cap = max(128, min(int(max_tile_n), vmem_budget_bytes // (tb * bytes_per_elem))
              // 128 * 128)
    tn = min(cap, n_pad128)
    return tb, tn


def _run_seg_loss_kernel(x2d, t2d, *, bce_out_dtype=jnp.bfloat16,
                         max_tile_n=32768, vmem_budget_bytes=20 * 1024 * 1024):
    B, N = x2d.shape
    tb, tn = _pick_tiles(B, N, x2d.dtype, t2d.dtype, bce_out_dtype,
                         max_tile_n, vmem_budget_bytes)

    n_padded = pl.cdiv(N, tn) * tn
    if n_padded != N:
        pad = n_padded - N
        # Padded logits are very negative and padded targets are 0, so the
        # padded BCE is exactly 0 (never enters the top-k, since k is computed
        # from the unpadded count) and the dice partial sums get 0 contribution.
        x2d = jnp.pad(x2d, ((0, 0), (0, pad)), constant_values=-1e4)
        t2d = jnp.pad(t2d, ((0, 0), (0, pad)), constant_values=0)

    grid = (B // tb, n_padded // tn)

    return pl.pallas_call(
        _seg_loss_kernel,
        out_shape=(
            # Per-element BCE (feeds the batch-wide OHEM top-k); bf16 halves
            # both the writeback and the downstream sort's input traffic.
            jax.ShapeDtypeStruct((B, n_padded), bce_out_dtype),
            jax.ShapeDtypeStruct((B, 1), jnp.float32),  # per-sample dice loss
        ),
        grid_spec=pltpu.PrefetchScalarGridSpec(
            num_scalar_prefetch=0,
            grid=grid,
            in_specs=[
                pl.BlockSpec((tb, tn), lambda i, j: (i, j)),
                pl.BlockSpec((tb, tn), lambda i, j: (i, j)),
            ],
            out_specs=[
                pl.BlockSpec((tb, tn), lambda i, j: (i, j)),
                pl.BlockSpec((tb, 1), lambda i, j: (i, 0)),  # resident over j
            ],
            scratch_shapes=[pltpu.VMEM((tb, 1), jnp.float32)] * 3,  # a, b, c
        ),
        compiler_params=pltpu.CompilerParams(
            dimension_semantics=("parallel", "arbitrary"),
            vmem_limit_bytes=32 * 1024 * 1024,
        ),
    )(x2d, t2d)


# --------------------------------------------------------------------------- #
# OHEM + wrapper (thin JAX glue around the kernel)                            #
# --------------------------------------------------------------------------- #
def _ohem_mean(loss_flat, keep_ratio, n_valid=None):
    # TODO(synk): jax.lax.top_k over the full B*C*H*W BCE map lowers to a sort
    # that dominates wall clock for large masks; an in-kernel histogram +
    # threshold OHEM would remove it. Kept exact here to match torch.
    n = int(loss_flat.shape[0]) if n_valid is None else int(n_valid)
    k = max(int(keep_ratio * n), 1)  # torch: int(keep_ratio*len(loss)); clamp >=1
    topk, _ = jax.lax.top_k(loss_flat, k)
    return jnp.mean(topk, dtype=jnp.float32)


def cls_segmentation_loss_with_ohem(head_out, cls_out, head_targets, cls_targets,
                                     keep_ratio: float = 0.7,
                                     bce_ratio: float = 0.5,
                                     bce_out_dtype=jnp.bfloat16,
                                     max_tile_n: int = 32768):
    B = head_out.shape[0]
    n_real = 1
    for d in head_out.shape[1:]:
        n_real *= int(d)

    # torch: inputs.flatten(1) on NCHW -> (B, C*H*W). Inputs/targets stay in
    # their native dtype (no extra wrapper cast pass); supplying bf16/uint8
    # binary masks upstream halves/quarters the target DMA traffic.
    head_x2d = head_out.reshape(B, -1)
    head_t2d = head_targets.reshape(B, -1)

    bce_head, dice = _run_seg_loss_kernel(
        head_x2d, head_t2d, bce_out_dtype=bce_out_dtype, max_tile_n=max_tile_n)

    # DiceBCELossWithOHEM — OHEM pools are batch-wide, matching torch .flatten().
    # Sort in the kernel's output dtype (no f32 up-cast copy of the BCE map).
    bce_ohem = _ohem_mean(bce_head.reshape(-1), keep_ratio, n_valid=B * n_real)
    dice_ohem = _ohem_mean(dice.reshape(-1), keep_ratio)
    seg_loss = bce_ratio * bce_ohem + (1.0 - bce_ratio) * dice_ohem

    # cls path: only (B, 1) values — plain JAX keeps every Pallas out_spec
    # lane-dense and avoids re-DMAing a tiny block every grid step.
    cls_x = cls_out.reshape(B, -1).astype(jnp.float32)
    cls_t = cls_targets.reshape(B, 1).astype(jnp.float32)
    cls_bce = (jnp.maximum(cls_x, 0.0) - cls_x * cls_t
               + jnp.log1p(jnp.exp(-jnp.abs(cls_x))))
    cls_loss = _ohem_mean(cls_bce.reshape(-1), keep_ratio)

    # torch.sum over scalar losses is identity; total is a scalar.
    return seg_loss + cls_loss


# --------------------------------------------------------------------------- #
# Pure-JAX reference (for a sanity check in __main__)                         #
# --------------------------------------------------------------------------- #
def _reference_loss(head_out, cls_out, head_targets, cls_targets,
                    keep_ratio=0.7, bce_ratio=0.5):
    B = head_out.shape[0]
    x = head_out.reshape(B, -1).astype(jnp.float32)
    t = head_targets.reshape(B, -1).astype(jnp.float32)
    bce = jnp.maximum(x, 0.0) - x * t + jnp.log1p(jnp.exp(-jnp.abs(x)))
    p = jax.nn.sigmoid(x)
    a = jnp.sum(p * t, axis=1)
    b = jnp.sum(p * p, axis=1)
    c = jnp.sum(t * t, axis=1)
    dice = 1.0 - 2.0 * a / (b + c + DICE_DELTA)
    seg = (bce_ratio * _ohem_mean(bce.reshape(-1), keep_ratio)
           + (1.0 - bce_ratio) * _ohem_mean(dice, keep_ratio))
    cx = cls_out.reshape(B, -1).astype(jnp.float32)
    ct = cls_targets.reshape(B, 1).astype(jnp.float32)
    cls_bce = jnp.maximum(cx, 0.0) - cx * ct + jnp.log1p(jnp.exp(-jnp.abs(cx)))
    return seg + _ohem_mean(cls_bce.reshape(-1), keep_ratio)


if __name__ == "__main__":
    key = jax.random.PRNGKey(0)
    k1, k2, k3, k4, k5, k6 = jax.random.split(key, 6)

    # Case 1: 128-aligned N, small max_tile_n so the multi-tile reduction /
    # pl.when accumulator path is exercised (N = 1024 -> 4 N-tiles of 256).
    B, C, H, W = 2, 1, 32, 32
    head_out = jax.random.normal(k1, (B, C, H, W), dtype=jnp.float32)
    head_targets = jax.random.bernoulli(k2, 0.5, (B, C, H, W)).astype(jnp.bfloat16)
    cls_out = jax.random.normal(k3, (B, 1), dtype=jnp.float32)
    cls_targets = jax.random.bernoulli(k4, 0.5, (B,)).astype(jnp.float32)

    total = cls_segmentation_loss_with_ohem(
        head_out, cls_out, head_targets, cls_targets, max_tile_n=256)
    total = jax.block_until_ready(total)
    ref = _reference_loss(head_out, cls_out, head_targets, cls_targets)
    assert total.shape == () and jnp.isfinite(total)
    assert jnp.allclose(total, ref, rtol=2e-2, atol=1e-3), (total, ref)

    # Case 2: non-128-aligned N (H = W = 18 -> N = 324) exercises the padding
    # path (pads to a multiple of the 128-lane tile with -1e4 logits / 0 targets).
    H2 = W2 = 18
    head_out2 = jax.random.normal(k5, (B, C, H2, W2), dtype=jnp.float32)
    head_targets2 = jax.random.bernoulli(k6, 0.5, (B, C, H2, W2)).astype(jnp.bfloat16)

    total2 = cls_segmentation_loss_with_ohem(
        head_out2, cls_out, head_targets2, cls_targets, max_tile_n=128)
    total2 = jax.block_until_ready(total2)
    ref2 = _reference_loss(head_out2, cls_out, head_targets2, cls_targets)
    assert total2.shape == () and jnp.isfinite(total2)
    assert jnp.allclose(total2, ref2, rtol=2e-2, atol=1e-3), (total2, ref2)

    print("KERNEL_OK")
</pallas_src>

<mosaic_0001>
module attributes {stable_mosaic.version = 11 : i64} {
  func.func @_seg_loss_kernel(%arg0: i32, %arg1: i32, %arg2: memref<2x256xf32, #tpu.memory_space<vmem>>, %arg3: memref<2x256xbf16, #tpu.memory_space<vmem>>, %arg4: memref<2x256xbf16, #tpu.memory_space<vmem>>, %arg5: memref<2x1xf32, #tpu.memory_space<vmem>>, %arg6: memref<2x1xf32, #tpu.memory_space<vmem>>, %arg7: memref<2x1xf32, #tpu.memory_space<vmem>>, %arg8: memref<2x1xf32, #tpu.memory_space<vmem>>) attributes {dimension_semantics = [#tpu.dimension_semantics<parallel>, #tpu.dimension_semantics<arbitrary>], iteration_bounds = array<i64: 1, 4>, scalar_prefetch = 0 : i64, scratch_operands = 3 : i64, tpu.core_type = #tpu.core_type<tc>, window_params = [{transform_indices = @transform_0, window_bounds = array<i64: 2, 256>}, {transform_indices = @transform_1, window_bounds = array<i64: 2, 256>}, {transform_indices = @transform_2, window_bounds = array<i64: 2, 256>}, {transform_indices = @transform_3, window_bounds = array<i64: 2, 1>}]} {
    %c0_i32 = arith.constant 0 : i32
    %0 = arith.cmpi eq, %arg1, %c0_i32 : i32
    %1 = arith.extui %0 : i1 to i32
    %c0_i32_0 = arith.constant 0 : i32
    %2 = arith.cmpi ne, %1, %c0_i32_0 : i32
    scf.if %2 {
      %cst_27 = arith.constant 0.000000e+00 : f32
      %48 = vector.broadcast %cst_27 : f32 to vector<2x1xf32>
      %c0_28 = arith.constant 0 : index
      %c0_29 = arith.constant 0 : index
      %49 = vector.load %arg6[%c0_28, %c0_29] : memref<2x1xf32, #tpu.memory_space<vmem>>, vector<2x1xf32>
      tpu.vector_store %arg6[%c0_28, %c0_29], %48 {strides = array<i32>} : memref<2x1xf32, #tpu.memory_space<vmem>>, vector<2x1xf32>,
      %cst_30 = arith.constant 0.000000e+00 : f32
      %50 = vector.broadcast %cst_30 : f32 to vector<2x1xf32>
      %c0_31 = arith.constant 0 : index
      %c0_32 = arith.constant 0 : index
      %51 = vector.load %arg7[%c0_31, %c0_32] : memref<2x1xf32, #tpu.memory_space<vmem>>, vector<2x1xf32>
      tpu.vector_store %arg7[%c0_31, %c0_32], %50 {strides = array<i32>} : memref<2x1xf32, #tpu.memory_space<vmem>>, vector<2x1xf32>,
      %cst_33 = arith.constant 0.000000e+00 : f32
      %52 = vector.broadcast %cst_33 : f32 to vector<2x1xf32>
      %c0_34 = arith.constant 0 : index
      %c0_35 = arith.constant 0 : index
      %53 = vector.load %arg8[%c0_34, %c0_35] : memref<2x1xf32, #tpu.memory_space<vmem>>, vector<2x1xf32>
      tpu.vector_store %arg8[%c0_34, %c0_35], %52 {strides = array<i32>} : memref<2x1xf32, #tpu.memory_space<vmem>>, vector<2x1xf32>,
    } else {
    }
    %c0 = arith.constant 0 : index
    %c0_1 = arith.constant 0 : index
    %3 = vector.load %arg2[%c0, %c0_1] : memref<2x256xf32, #tpu.memory_space<vmem>>, vector<2x256xf32>
    %c0_2 = arith.constant 0 : index
    %c0_3 = arith.constant 0 : index
    %4 = vector.load %arg3[%c0_2, %c0_3] : memref<2x256xbf16, #tpu.memory_space<vmem>>, vector<2x256xbf16>
    %5 = arith.extf %4 : vector<2x256xbf16> to vector<2x256xf32>
    %6 = math.absf %3 : vector<2x256xf32>
    %cst = arith.constant 0.000000e+00 : f32
    %7 = vector.broadcast %cst : f32 to vector<2x256xf32>
    %8 = arith.subf %7, %6 : vector<2x256xf32>
    %9 = math.exp %8 : vector<2x256xf32>
    %cst_4 = arith.constant 0.000000e+00 : f32
    %10 = vector.broadcast %cst_4 : f32 to vector<2x256xf32>
    %11 = arith.maximumf %3, %10 : vector<2x256xf32>
    %12 = arith.mulf %3, %5 : vector<2x256xf32>
    %13 = arith.subf %11, %12 : vector<2x256xf32>
    %cst_5 = arith.constant 1.000000e+00 : f32
    %14 = vector.broadcast %cst_5 : f32 to vector<2x256xf32>
    %15 = arith.addf %14, %9 : vector<2x256xf32>
    %16 = math.log %15 : vector<2x256xf32>
    %17 = arith.addf %13, %16 : vector<2x256xf32>
    %18 = arith.truncf %17 : vector<2x256xf32> to vector<2x256xbf16>
    %c0_6 = arith.constant 0 : index
    %c0_7 = arith.constant 0 : index
    %19 = vector.load %arg4[%c0_6, %c0_7] : memref<2x256xbf16, #tpu.memory_space<vmem>>, vector<2x256xbf16>
    tpu.vector_store %arg4[%c0_6, %c0_7], %18 {strides = array<i32>} : memref<2x256xbf16, #tpu.memory_space<vmem>>, vector<2x256xbf16>,
    %cst_8 = arith.constant 0.000000e+00 : f32
    %20 = vector.broadcast %cst_8 : f32 to vector<2x256xf32>
    %21 = arith.cmpf oge, %3, %20 : vector<2x256xf32>
    %cst_9 = arith.constant 1.000000e+00 : f32
    %22 = vector.broadcast %cst_9 : f32 to vector<2x256xf32>
    %23 = arith.select %21, %22, %9 : vector<2x256xi1>, vector<2x256xf32>
    %cst_10 = arith.constant 1.000000e+00 : f32
    %24 = vector.broadcast %cst_10 : f32 to vector<2x256xf32>
    %25 = arith.addf %24, %9 : vector<2x256xf32>
    %26 = arith.divf %23, %25 : vector<2x256xf32>
    %c0_11 = arith.constant 0 : index
    %c0_12 = arith.constant 0 : index
    %27 = vector.load %arg6[%c0_11, %c0_12] : memref<2x1xf32, #tpu.memory_space<vmem>>, vector<2x1xf32>
    %28 = arith.mulf %26, %5 : vector<2x256xf32>
    %cst_13 = arith.constant dense<0.000000e+00> : vector<2xf32>
    %29 = vector.multi_reduction <add>, %28, %cst_13 [1] : vector<2x256xf32> to vector<2xf32>
    %30 = vector.shape_cast %29 : vector<2xf32> to vector<2x1xf32>
    %31 = arith.addf %27, %30 : vector<2x1xf32>
    %c0_14 = arith.constant 0 : index
    %c0_15 = arith.constant 0 : index
    %32 = vector.load %arg6[%c0_14, %c0_15] : memref<2x1xf32, #tpu.memory_space<vmem>>, vector<2x1xf32>
    tpu.vector_store %arg6[%c0_14, %c0_15], %31 {strides = array<i32>} : memref<2x1xf32, #tpu.memory_space<vmem>>, vector<2x1xf32>,
    %c0_16 = arith.constant 0 : index
    %c0_17 = arith.constant 0 : index
    %33 = vector.load %arg7[%c0_16, %c0_17] : memref<2x1xf32, #tpu.memory_space<vmem>>, vector<2x1xf32>
    %34 = arith.mulf %26, %26 : vector<2x256xf32>
    %cst_18 = arith.constant dense<0.000000e+00> : vector<2xf32>
    %35 = vector.multi_reduction <add>, %34, %cst_18 [1] : vector<2x256xf32> to vector<2xf32>
    %36 = vector.shape_cast %35 : vector<2xf32> to vector<2x1xf32>
    %37 = arith.addf %33, %36 : vector<2x1xf32>
    %c0_19 = arith.constant 0 : index
    %c0_20 = arith.constant 0 : index
    %38 = vector.load %arg7[%c0_19, %c0_20] : memref<2x1xf32, #tpu.memory_space<vmem>>, vector<2x1xf32>
    tpu.vector_store %arg7[%c0_19, %c0_20], %37 {strides = array<i32>} : memref<2x1xf32, #tpu.memory_space<vmem>>, vector<2x1xf32>,
    %c0_21 = arith.constant 0 : index
    %c0_22 = arith.constant 0 : index
    %39 = vector.load %arg8[%c0_21, %c0_22] : memref<2x1xf32, #tpu.memory_space<vmem>>, vector<2x1xf32>
    %40 = arith.mulf %5, %5 : vector<2x256xf32>
    %cst_23 = arith.constant dense<0.000000e+00> : vector<2xf32>
    %41 = vector.multi_reduction <add>, %40, %cst_23 [1] : vector<2x256xf32> to vector<2xf32>
    %42 = vector.shape_cast %41 : vector<2xf32> to vector<2x1xf32>
    %43 = arith.addf %39, %42 : vector<2x1xf32>
    %c0_24 = arith.constant 0 : index
    %c0_25 = arith.constant 0 : index
    %44 = vector.load %arg8[%c0_24, %c0_25] : memref<2x1xf32, #tpu.memory_space<vmem>>, vector<2x1xf32>
    tpu.vector_store %arg8[%c0_24, %c0_25], %43 {strides = array<i32>} : memref<2x1xf32, #tpu.memory_space<vmem>>, vector<2x1xf32>,
    %c3_i32 = arith.constant 3 : i32
    %45 = arith.cmpi eq, %arg1, %c3_i32 : i32
    %46 = arith.extui %45 : i1 to i32
    %c0_i32_26 = arith.constant 0 : i32
    %47 = arith.cmpi ne, %46, %c0_i32_26 : i32
    scf.if %47 {
      %c0_27 = arith.constant 0 : index
      %c0_28 = arith.constant 0 : index
      %48 = vector.load %arg6[%c0_27, %c0_28] : memref<2x1xf32, #tpu.memory_space<vmem>>, vector<2x1xf32>
      %cst_29 = arith.constant 2.000000e+00 : f32
      %49 = vector.broadcast %cst_29 : f32 to vector<2x1xf32>
      %50 = arith.mulf %49, %48 : vector<2x1xf32>
      %c0_30 = arith.constant 0 : index
      %c0_31 = arith.constant 0 : index
      %51 = vector.load %arg7[%c0_30, %c0_31] : memref<2x1xf32, #tpu.memory_space<vmem>>, vector<2x1xf32>
      %c0_32 = arith.constant 0 : index
      %c0_33 = arith.constant 0 : index
      %52 = vector.load %arg8[%c0_32, %c0_33] : memref<2x1xf32, #tpu.memory_space<vmem>>, vector<2x1xf32>
      %53 = arith.addf %51, %52 : vector<2x1xf32>
      %cst_34 = arith.constant 9.99999974E-6 : f32
      %54 = vector.broadcast %cst_34 : f32 to vector<2x1xf32>
      %55 = arith.addf %53, %54 : vector<2x1xf32>
      %56 = arith.divf %50, %55 : vector<2x1xf32>
      %cst_35 = arith.constant 1.000000e+00 : f32
      %57 = vector.broadcast %cst_35 : f32 to vector<2x1xf32>
      %58 = arith.subf %57, %56 : vector<2x1xf32>
      %c0_36 = arith.constant 0 : index
      %c0_37 = arith.constant 0 : index
      %59 = vector.load %arg5[%c0_36, %c0_37] : memref<2x1xf32, #tpu.memory_space<vmem>>, vector<2x1xf32>
      tpu.vector_store %arg5[%c0_36, %c0_37], %58 {strides = array<i32>} : memref<2x1xf32, #tpu.memory_space<vmem>>, vector<2x1xf32>,
    } else {
    }
    return
  }
  func.func @transform_0(%arg0: i32, %arg1: i32) -> (i32, i32) {
    %c0_i32 = arith.constant 0 : i32
    return %arg0, %arg1 : i32, i32
  }
  func.func @transform_1(%arg0: i32, %arg1: i32) -> (i32, i32) {
    %c0_i32 = arith.constant 0 : i32
    return %arg0, %arg1 : i32, i32
  }
  func.func @transform_2(%arg0: i32, %arg1: i32) -> (i32, i32) {
    %c0_i32 = arith.constant 0 : i32
    return %arg0, %arg1 : i32, i32
  }
  func.func @transform_3(%arg0: i32, %arg1: i32) -> (i32, i32) {
    %c0_i32 = arith.constant 0 : i32
    %c0_i32_0 = arith.constant 0 : i32
    return %arg0, %c0_i32 : i32, i32
  }
}

</mosaic_0001>

<bundles_post_ra>
// kernel: tpu_custom_call.1
= control target key start
LH: loop header
LB: loop body
LE: loop exit
PB: predicated region body
PF: predicated region fallthrough
CT: control target
= control target key end

     0   :  { %9 = vsyncpa [#allocation6], 0  ;;  %s967_s0 = inlined_call_operand.hbm [shape: f32[2,1024], index: 0, kind: input, shape index: {}]   ;;  %s968_s1 = inlined_call_operand.hbm [shape: bf16[2,1024], index: 1, kind: input, shape index: {}]   ;;  %s969_s2 = inlined_call_operand.hbm [shape: bf16[2,1024], index: 2, kind: output, shape index: {0}]   ;;  %s970_s3 = inlined_call_operand.vmem [shape: f32[2,1], index: 3, kind: output, shape index: {1}]  }
   0x1   :  { %11 = vsyncpa [#allocation6 + $0x1], 0 }
   0x2   :  { %12 = vsyncpa [#allocation9], 0 }
   0x3   :  { %14 = vsyncpa [#allocation9 + $0x1], 0 }
   0x4   :  { %15 = vsyncpa [#allocation7], 0 }
   0x5   :  { %17 = vsyncpa [#allocation7 + $0x1], 0  ;;  %s812_s12 = smov 0   ;;  %s814_s13 = smov 0  }
   0x6   :  { %s816_s14 = smov 0   ;;  %s818_s15 = smov 0  }
   0x7   :  { %s820_s16 = smov 0   ;;  %s822_s17 = smov 0  }
   0x8 LB: > { %s546_s18 = sadd.s32 4294967295, %s789_s17   ;;  %s547_s19 = sadd.s32 4294967294, %s789_s17   ;;  %s789_s17 = sphi %s822_s17, %s23_s17   ;;  %s785_s16 = sphi %s820_s16, %s980_s16   ;;  %s781_s15 = sphi %s818_s15, %s979_s15   ;;  %s777_s14 = sphi %s816_s14, %s978_s14   ;;  %s773_s13 = sphi %s814_s13, %s977_s13   ;;  %s769_s12 = sphi %s812_s12, %s976_s12  }
   0x9   : > { %s32_s20 = sadd.s32 1, %s785_s16  ;;  %s44_s21 = sadd.s32 1, %s777_s14 }
   0xa   : > { %p33_p0 = scmp.ge.s32.totalorder %s32_s20, 4  ;;  %p51_p1 = scmp.ne.s32.totalorder %s777_s14, %s773_s13 }
   0xb   : > { %p52_p2 = scmp.eq.s32.totalorder %s789_s17, 0  ;;  %p57_p3 = scmp.ne.s32.totalorder %s773_s13, %s769_s12 }
   0xc   : > { %s982_s20 = smov (%p33_p0, %s32_s20), 0  ;;  %p58_p5 = scmp.eq.s32.totalorder %s546_s18, 0 }
   0xd   : > { %p853_p4 = por %p52_p2, %p51_p1  ;;  %s40_s23 = ssub.s32 %s785_s16, %s982_s20 }
   0xe   : > { %p111_p6 = scmp.eq.s32.totalorder %s546_s18, 3  ;;  %p42_p7 = scmp.eq.s32.totalorder %s40_s23, 0 }
   0xf   : > { %p859_p8 = por %p58_p5, %p57_p3  ;;  %p117_p10 = scmp.eq.s32.totalorder %s547_s19, 3 }
  0x10   : > { %p863_p9 = por %p111_p6, %p51_p1  ;;  %p584_p12 = scmp.lt.s32.totalorder %s789_s17, 4 }
  0x11   : > { %s868_s26 = scalar_select %p42_p7, %s777_s14, %s44_s21  }
  0x12   : > { %p870_p11 = por %p117_p10, %p57_p3  ;;  %s163_s28 = sand.u32 1, %s777_s14  }
  0x13   : > { %s550_s29 = sshll.u32 %s163_s28, 2  ;;  %s566_s30 = sshll.u32 %s785_s16, 2 }
  0x14   : > { %s174_s6 = scalar_lea.hbm %s967_s0, %s566_s30  ;;  %s167_s7 = scalar_lea.vmem [#allocation5], %s550_s29 }
  0x15   : > { %s178_s8 = sshll.u32 %s167_s7, 4  ;;  %s176_s9 = sshll.u32 %s174_s6, 4  ;;  %s179_s8 = int_to_ptr.vmem [resolvable:$true] %s178_s8  ;;  %s177_s9 = int_to_ptr.hbm [resolvable:$true] %s176_s9 }
  0x16   : > { %p882_p13 = pnand %p584_p12, %p853_p4  ;;  %p555_p0 = scmp.ge.s32.totalorder %s789_s17, 1 }
  0x17   : > { %p204_p1 = scmp.lt.s32.totalorder %s789_s17, 5  ;;  %s164_s11 = scalar_lea.sflag [#allocation6], %s163_s28 }
  0x18   : > { %576 = dma.hbm_to_vmem [thread:$0]  (!%p882_p13), %s177_s9, 64, %s179_s8, %s164_s11  }
  0x19   : > { %p205_p2 = pnand %p555_p0, %p204_p1  ;;  %s553_s18 = sshll.u32 %s163_s28, 1 }
  0x1a   : > { %s554_s19 = sshll.u32 %s785_s16, 1  ;;  %s189_s30 = scalar_lea.vmem [#allocation8], %s553_s18 }
  0x1b   : > { %s195_s29 = scalar_lea.hbm %s968_s1, %s554_s19  ;;  %s199_s22 = sshll.u32 %s189_s30, 4  ;;  %s200_s22 = int_to_ptr.vmem [resolvable:$true] %s199_s22 }
  0x1c   : > { %s197_s4 = sshll.u32 %s195_s29, 4  ;;  %s186_s5 = scalar_lea.sflag [#allocation9], %s163_s28  ;;  %s198_s4 = int_to_ptr.hbm [resolvable:$true] %s197_s4 }
  0x1d   : > { %579 = dma.hbm_to_vmem [thread:$0]  (!%p882_p13), %s198_s4, 32, %s200_s22, %s186_s5  }
  0x1e   : > { %208 = sbr.rel (%p205_p2) target bundleno = 282 (0x11a), region = 28  ;;  %s897_s6 = sand.u32 (!%p205_p2), 1, %s773_s13  }
  0x1f   : > { %s556_s7 = sshll.u32 (!%p205_p2), %s897_s6, 2  ;;  %s211_s8 = scalar_lea.sflag (!%p205_p2), [#allocation6], %s897_s6 }
  0x20   : > { %s214_s9 = scalar_lea.vmem (!%p205_p2), [#allocation5], %s556_s7 }
  0x23   : > { %756 = dma.done.wait (%p859_p8), %s211_s8, 64  }
  0x24   : > { %758 = vsyncadd (%p859_p8), %s211_s8, 4294967232  ;;  %s557_s28 = sshll.u32 %s897_s6, 1  ;;  %s221_s10 = scalar_lea.sflag [#allocation9], %s897_s6 }
  0x25   : > { %s224_s11 = scalar_lea.vmem [#allocation8], %s557_s28 }
  0x26   : > { %760 = dma.done.wait (%p859_p8), %s221_s10, 32  }
  0x27   : > { %762 = vsyncadd (%p859_p8), %s221_s10, 4294967264  ;;  %s911_s18 = scalar_lea.vmem [#allocation10], %s557_s28  ;;  %p559_p3 = scmp.ne.s32.totalorder %s781_s15, 0 }
  0x29   : > { %267 = sbr.rel (%p559_p3) target bundleno = 50 (0x32), region = 40 }
  0x2e   : > { %vm268_vm0 = vcmask 1024   ;;  %v791_v0 = vmov 0.0  }
  0x2f   : > { %269 = vst.msk [vmem:[#allocation2] sm:$0x3] %vm268_vm0, %v791_v0 }
  0x30   : > { %270 = vst.msk [vmem:[#allocation3] sm:$0x3] %vm268_vm0, %v791_v0 }
  0x31   : > { %271 = vst.msk [vmem:[#allocation4] sm:$0x3] %vm268_vm0, %v791_v0 }
  0x32 PF: > { %v272_v1 = vld [vmem:[%s214_s9] sm:$0xf]  ;;  %v273_v5 = vld [vmem:[%s224_s11] sm:$0x3]  ;;  %vm295_vm6 = vcmask 1040384   ;;  %vm326_vm7 = vcmask 1041408  }
  0x33   : > { %v275_v2 = vand.u32 2147483647, %v272_v1  ;;  %v274_v7 = vunpack.c.l.bf16 %v273_v5  ;;  %v279_v9 = vmax.f32 %v272_v1, 0.0  ;;  %vm301_vm3 = vcmp.ge.f32.partialorder %v272_v1, 0.0  ;;  %p560_p4 = scmp.ne.s32.totalorder %s781_s15, 3 }
  0x34   : > { %vm333_vm8 = vcmask 1024  }
  0x35   : > { %v276_v3 = vsub.f32 0.0, %v275_v2  ;;  %v280_v10 = vmul.f32 %v274_v7, %v272_v1  ;;  %v351_v39 = vmul.f32 %v274_v7, %v274_v7 }
  0x36   : > { %v318_v50 = vld [vmem:[#allocation2] sm:$0x3] }
  0x37   : > { %v277_v4 = vmul.f32 1.442695, %v276_v3  ;;  %v281_v11 = vsub.f32 %v279_v9, %v280_v10  ;;  %v335_v53 = vld [vmem:[#allocation3] sm:$0x3] }
  0x38   : > { %v350_v56 = vld [vmem:[#allocation4] sm:$0x3] }
  0x39   : > { %635 = vpow2.f32 %v277_v4 }
  0x3f   : > { %v636_v6 = vpop.eup %635 }
  0x40   : > { %v282_v8 = vadd.f32 1.0, %v636_v6  ;;  %v302_v23 = vsel %vm301_vm3, 1.0, %v636_v6 }
  0x42   : > { %637 = vlog2.f32 %v282_v8  ;;  %v314_v17 = vand.u32 2147483648, %v282_v8  ;;  %vm308_vm1 = vweird.f32 %v282_v8  ;;  %v312_v19 = vand.u32 2147483647, %v282_v8 }
  0x43   : > { %639 = vrcp.f32 %v282_v8 }
  0x44   : > { %v315_v21 = vor.u32 1.1754944e-38, %v314_v17  ;;  %vm313_vm5 = vcmp.eq.f32.partialorder %v312_v19, 8.507059e+37 }
  0x48   : > { %v638_v12 = vpop.eup %637 }
  0x49   : > { %v640_v13 = vpop.eup %639  ;;  %v284_v14 = vmul.f32 0.6931472, %v638_v12 }
  0x4a   : > { %v304_v15 = vmul.f32 %v640_v13, %v282_v8  ;;  %vm309_vm2 = vweird.f32 %v640_v13 }
  0x4b   : > { %v285_v16 = vadd.f32 %v284_v14, %v281_v11  ;;  %vm310_vm4 = vmor %vm308_vm1, %vm309_vm2 }
  0x4c   : > { %v305_v18 = vsub.f32 1.0, %v304_v15 }
  0x4d   : > { %287 = vst [vmem:[#allocation1] ss:$4 sm:$0xff] %v285_v16 }
  0x4e   : > { %v306_v20 = vmul.f32 %v640_v13, %v305_v18 }
  0x50   : > { %v307_v22 = vadd.f32 %v640_v13, %v306_v20 }
  0x52   : > { %v311_v24 = vsel %vm310_vm4, %v640_v13, %v307_v22 }
  0x53   : > { %v316_v25 = vsel %vm313_vm5, %v315_v21, %v311_v24 }
  0x54   : > { %v288_v26 = vld.sshfl [vmem:[#allocation1] sm:$0xff pattern:$0x73625140]  ;;  %v289_v27 = vld.sshfl [vmem:[#allocation1 + $0x8] sm:$0xff pattern:$0x73625140]  ;;  %v317_v28 = vmul.f32 %v316_v25, %v302_v23 }
  0x55   : > { %v292_v29 = vpack.c.bf16 %v289_v27, %v288_v26 }
  0x56   : > { %v319_v30 = vmul.f32 %v317_v28, %v274_v7  ;;  %v336_v33 = vmul.f32 %v317_v28, %v317_v28 }
  0x57   : > { %v294_v31 = vrot.slane %v292_v29, 3 }
  0x58   : > { %321 = vst [vmem:[#allocation1] ss:$4 sm:$0xff] %v319_v30 }
  0x59   : > { %v298_v32 = vsel %vm295_vm6, %v292_v29, %v294_v31 }
  0x5a   : > { %300 = vst [vmem:[%s911_s18] sm:$0x3] %v298_v32 }
  0x5f   : > { %v322_v34 = vld.sshfl [vmem:[#allocation1] sm:$0xff pattern:$0x73625140]  ;;  %v323_v35 = vld.sshfl [vmem:[#allocation1 + $0x8] sm:$0xff pattern:$0x73625140] }
  0x60   : > { %v327_v36 = vsel %vm326_vm7, %v322_v34, 0.0  ;;  %v328_v37 = vsel %vm326_vm7, %v323_v35, 0.0  ;;  %338 = vst [vmem:[#allocation1] ss:$4 sm:$0xff] %v336_v33 }
  0x61   : > { %v329_v38 = vadd.f32 %v328_v37, %v327_v36 }
  0x63   : > { %330 = vadd.xlane.f32.xlu0 %v329_v38 }
  0x67   : > { %v339_v40 = vld.sshfl [vmem:[#allocation1] sm:$0xff pattern:$0x73625140]  ;;  %v340_v41 = vld.sshfl [vmem:[#allocation1 + $0x8] sm:$0xff pattern:$0x73625140] }
  0x68   : > { %353 = vst [vmem:[#allocation1] ss:$4 sm:$0xff] %v351_v39  ;;  %v343_v42 = vsel %vm326_vm7, %v339_v40, 0.0  ;;  %v344_v43 = vsel %vm326_vm7, %v340_v41, 0.0 }
  0x69   : > { %v345_v44 = vadd.f32 %v344_v43, %v343_v42 }
  0x6b   : > { %346 = vadd.xlane.f32.xlu0 %v345_v44 }
  0x6f   : > { %v354_v45 = vld.sshfl [vmem:[#allocation1] sm:$0xff pattern:$0x73625140]  ;;  %v355_v46 = vld.sshfl [vmem:[#allocation1 + $0x8] sm:$0xff pattern:$0x73625140] }
  0x70   : > { %v358_v47 = vsel %vm326_vm7, %v354_v45, 0.0  ;;  %v359_v48 = vsel %vm326_vm7, %v355_v46, 0.0 }
  0x71   : > { %v360_v49 = vadd.f32 %v359_v48, %v358_v47 }
  0x73   : > { %361 = vadd.xlane.f32.xlu1 %v360_v49 }
  0xd6   : > { %v331_v51 = vpop.xlane.xlu0 %330 }
  0xd7   : > { %v332_v52 = vadd.f32 %v331_v51, %v318_v50 }
  0xd9   : > { %334 = vst.msk [vmem:[#allocation2] sm:$0x3] %vm333_vm8, %v332_v52 }
  0xde   : > { %v347_v54 = vpop.xlane.xlu0 %346 }
  0xdf   : > { %v348_v55 = vadd.f32 %v347_v54, %v335_v53 }
  0xe1   : > { %349 = vst.msk [vmem:[#allocation3] sm:$0x3] %vm333_vm8, %v348_v55 }
  0xe5   : > { %368 = sbr.rel (%p560_p4) target bundleno = 267 (0x10b), region = 44 }
  0xe6   : > { %v362_v57 = vpop.xlane.xlu1 %361 }
  0xe7   : > { %v363_v58 = vadd.f32 %v362_v57, %v350_v56 }
  0xe9   : > { %364 = vst.msk [vmem:[#allocation4] sm:$0x3] %vm333_vm8, %v363_v58 }
  0xea   : > { %v371_v59 = vld [vmem:[#allocation3] sm:$0x3]  ;;  %v369_v4 = vld [vmem:[#allocation2] sm:$0x3] }
  0xeb   : > { %v370_v7 = vmul.f32 2.0, %v369_v4 }
  0xf0   : > { %v372_v60 = vld [vmem:[#allocation4] sm:$0x3] }
  0xf1   : > { %v373_v61 = vadd.f32 %v372_v60, %v371_v59 }
  0xf3   : > { %v374_v62 = vadd.f32 1e-05, %v373_v61 }
  0xf5   : > { %641 = vrcp.f32 %v374_v62  ;;  %v386_v1 = vand.u32 2147483648, %v374_v62  ;;  %vm380_vm9 = vweird.f32 %v374_v62  ;;  %v384_v3 = vand.u32 2147483647, %v374_v62 }
  0xf7   : > { %v387_v6 = vor.u32 1.1754944e-38, %v386_v1  ;;  %vm385_vm12 = vcmp.eq.f32.partialorder %v384_v3, 8.507059e+37 }
  0xfb   : > { %v642_v63 = vpop.eup %641 }
  0xfc   : > { %v376_v0 = vmul.f32 %v642_v63, %v374_v62  ;;  %vm381_vm10 = vweird.f32 %v642_v63 }
  0xfd   : > { %vm382_vm11 = vmor %vm380_vm9, %vm381_vm10 }
  0xfe   : > { %v377_v2 = vsub.f32 1.0, %v376_v0 }
 0x100   : > { %v378_v5 = vmul.f32 %v642_v63, %v377_v2 }
 0x102   : > { %v379_v8 = vadd.f32 %v642_v63, %v378_v5 }
 0x104   : > { %v383_v9 = vsel %vm382_vm11, %v642_v63, %v379_v8 }
 0x105   : > { %v388_v10 = vsel %vm385_vm12, %v387_v6, %v383_v9 }
 0x106   : > { %v389_v11 = vmul.f32 %v388_v10, %v370_v7 }
 0x108   : > { %v390_v12 = vsub.f32 1.0, %v389_v11 }
 0x10a   : > { %391 = vst.msk [vmem:[%s970_s3] sm:$0x3] %vm333_vm8, %v390_v12 }
 0x10b PF: > { %s562_s21 = sshll.u32 %s781_s15, 1  ;;  %s411_s22 = sshll.u32 %s911_s18, 4  ;;  %s412_s22 = int_to_ptr.vmem [resolvable:$true] %s411_s22 }
 0x10c   : > { %s409_s30 = scalar_lea.hbm %s969_s2, %s562_s21  ;;  %s393_s5 = scalar_lea.sflag [#allocation7], %s897_s6 }
 0x10d   : > { %s413_s4 = sshll.u32 %s409_s30, 4  ;;  %s723_s15 = scalar_lea.hbm %s969_s2, 8  ;;  %s414_s4 = int_to_ptr.hbm [resolvable:$true] %s413_s4 }
 0x10e   : > { %s717_s7 = sshra.s32 %s414_s4, 4  ;;  %s718_s7 = int_to_ptr.hbm [resolvable:$true] %s717_s7 }
 0x10f   : > { %s719_s8 = scalar_lea.hbm %s718_s7, 2  ;;  %p724_p8 = scmp.lt.s32.totalorder %s718_s7, %s969_s2 }
 0x110   : > { %p720_p5 = scmp.ne.s32.totalorder %s718_s7, %s719_s8  ;;  %p725_p10 = scmp.lt.s32.totalorder %s723_s15, %s719_s8 }
 0x112   : > { %p721_p6 = pnand %p720_p5, %p863_p9  ;;  %p726_p12 = por %p725_p10, %p724_p8 }
 0x114   : > { %p722_p7 = pneg %p721_p6 }
 0x116   : > { %p727_p13 = pnand %p726_p12, %p722_p7 }
 0x118   : > { %730 = shalt.err (!%p727_p13)
}
 0x119   : > { %571 = dma.vmem_to_hbm [thread:$0]  (%p863_p9), %s412_s22, 32, %s414_s4, %s393_s5  }
 0x11a PF: > { %p585_p0 = scmp.ge.s32.totalorder %s789_s17, 2  ;;  %s435_s6 = sand.u32 1, %s769_s12  }
 0x11b   : > { %s436_s18 = scalar_lea.sflag [#allocation7], %s435_s6 }
 0x11c   : > { %p581_p1 = pnand %p585_p0, %p870_p11 }
 0x11e   : > { %p582_p2 = pneg %p581_p1 }
 0x120   : > { %764 = dma.done.wait (%p582_p2), %s436_s18, 32  }
 0x121   : > { %766 = vsyncadd (%p582_p2), %s436_s18, 4294967264  ;;  %s23_s17 = sadd.s32 1, %s789_s17   ;;  %s976_s12 = smov %s773_s13 }
 0x122   : > { %p20_p3 = scmp.ge.s32.totalorder %s23_s17, 6   ;;  %s977_s13 = smov %s777_s14 }
 0x123   : > { %s978_s14 = smov %s868_s26  ;;  %s979_s15 = smov %s785_s16 }
 0x124   : > { %s980_s16 = smov %s982_s20  ;;  %22 = sbr.rel (!%p20_p3) target bundleno = 8 (0x8), region = 106 }
 0x129   :  { %442 = vsyncpa [#allocation6], 1 }
 0x12a   :  { %444 = vsyncpa [#allocation6 + $0x1], 1 }
 0x12b   :  { %445 = vsyncpa [#allocation9], 1 }
 0x12c   :  { %447 = vsyncpa [#allocation9 + $0x1], 1 }
 0x12d   :  { %448 = vsyncpa [#allocation7], 1 }
 0x12e   :  { %450 = vsyncpa [#allocation7 + $0x1], 1 }

</bundles_post_ra>
